<compile_context>
chip_gen: v7x
topology: tpu7x:2x2x1
jax: 0.10.0
libtpu: 0.0.40
codegen_flags: <defaults>
</compile_context>

<pallas_src>
import jax
import jax.numpy as jnp
from jax import lax
from jax.experimental import pallas as pl
from jax.experimental.pallas import tpu as pltpu


_STATIC_CIN_UNROLL = 16   # fully unroll the Cin loop up to this many channels
_ACC_ELEMS = 8192         # 2*sub*tl <= 2*_ACC_ELEMS f32 -> acc_r+acc_i <= ~16 vregs


def _spectral_mix_kernel(x_ref, w_ref, o_ref):
    """Per-mode complex channel mixing:  y[b,o,m] = sum_i x[b,i,m] * w[i,o,m].

    x_ref: (2, TB, Cin, TL)   stacked [Xr ; Xi] spectral modes (lane-dense TL)
    w_ref: (2, Cin, TC, TL)   stacked [Wr ; Wi] weights (no 2x duplication)
    o_ref: (2, TB, TC, TL)    stacked [Yr ; Yi] output modes
    """
    _, n_b, cin, tl = x_ref.shape
    tc = w_ref.shape[2]
    # Cout sub-block: bounds the live accumulator to <= ~16 vregs (feedback #3).
    sub_rows = max(1, min(tc, 32, _ACC_ELEMS // tl))

    def accum(xr_row, xi_row, wr_blk, wi_blk, acc_r, acc_i):
        # Broadcast the x row across the output sublanes ONCE; both cross terms
        # reuse it (JAX does not CSE broadcast_in_dim).
        xr = jnp.broadcast_to(xr_row, wr_blk.shape)
        xi = jnp.broadcast_to(xi_row, wr_blk.shape)
        acc_r = acc_r + xr * wr_blk - xi * wi_blk
        acc_i = acc_i + xr * wi_blk + xi * wr_blk
        return acc_r, acc_i

    for b in range(n_b):                        # static: batch rows in this block
        for c0 in range(0, tc, sub_rows):       # static: bounded-vreg cout sub-blocks
            sub = min(sub_rows, tc - c0)
            zero = jnp.zeros((sub, tl), jnp.float32)

            if cin <= _STATIC_CIN_UNROLL:
                # Small Cin (typical FNO): fully static indices, no dyn. slicing.
                acc_r, acc_i = zero, zero
                for i in range(cin):
                    acc_r, acc_i = accum(
                        x_ref[0, b, i:i + 1, :], x_ref[1, b, i:i + 1, :],
                        w_ref[0, i, c0:c0 + sub, :], w_ref[1, i, c0:c0 + sub, :],
                        acc_r, acc_i)
            else:
                def body(i, carry):
                    return accum(
                        x_ref[0, b, pl.ds(i, 1), :], x_ref[1, b, pl.ds(i, 1), :],
                        w_ref[0, i, c0:c0 + sub, :], w_ref[1, i, c0:c0 + sub, :],
                        *carry)
                # Bounded unroll keeps code size sane for large Cin while giving
                # the scheduler a window to hide the per-row loads (feedback #4).
                acc_r, acc_i = lax.fori_loop(0, cin, body, (zero, zero), unroll=8)

            o_ref[0, b, c0:c0 + sub, :] = acc_r
            o_ref[1, b, c0:c0 + sub, :] = acc_i


def _round_up(value, multiple):
    return ((value + multiple - 1) // multiple) * multiple


def _vmem_budget_bytes():
    """Per-step VMEM budget (double-buffer aware) and the compiler limit."""
    try:
        cap = pltpu.get_tpu_info().vmem_capacity_bytes
    except Exception:
        cap = 64 << 20            # conservative default (v7x-sized)
    # 128-MiB parts (v5e / v6e) can afford a 64 MiB scoped limit; v7x (64 MiB
    # physical per TensorCore) stays at 32 MiB (feedback #5 / #6).
    limit = (64 << 20) if cap >= (128 << 20) else (32 << 20)
    return (limit * 3) // 4, limit


def _select_tiles(batch, cin, cout, n_modes):
    """Pick (batch_tile, cout_tile, lane_tile) so the double-buffered
    x + w + out blocks all fit the scoped-VMEM budget with headroom."""
    budget, vmem_limit = _vmem_budget_bytes()

    def blocks_bytes(tb, tc, tl):
        x_blk = 2 * tb * cin * tl * 4
        w_blk = 2 * cin * tc * tl * 4
        y_blk = 2 * tb * tc * tl * 4
        return 2 * (x_blk + w_blk + y_blk)      # x2: double-buffered pipeline

    m128 = _round_up(n_modes, 128)
    # Widest lane tile first: m128 gives a single, minimally-padded lane tile;
    # otherwise pad the mode axis UP to the tile (feedback #7), never below 128.
    lane_tiles = [m128] + [t for t in (1024, 512, 256, 128) if t < m128]
    b_tiles = [d for d in range(min(batch, 8), 0, -1) if batch % d == 0]
    c_tiles = ([cout] if cout <= 128 else []) \
        + [d for d in (128, 64, 32, 16, 8) if d < cout and cout % d == 0]
    if not c_tiles:
        c_tiles = [cout]

    for tl in lane_tiles:
        for tb in b_tiles:
            for tc in c_tiles:
                if blocks_bytes(tb, tc, tl) <= budget:
                    return tb, tc, tl, vmem_limit
    return 1, c_tiles[-1], 128, vmem_limit


def pack_spectral_weights(weights1, weights2, batch_size):
    """One-time (init-time) weight packing: fuse the top/bottom mode blocks,
    split real/imag into a stacked leading axis (NO [[Wr,Wi],[-Wi,Wr]] 2x
    duplication), flatten the modes to a lane axis and zero-pad it to the
    selected lane tile (feedback #1 / #9)."""
    w = jnp.concatenate([weights1, weights2], axis=2)        # (Cin, Cout, 2*m1, m2)
    cin, cout, m1x2, m2 = w.shape
    n_modes = m1x2 * m2
    tb, tc, tl, vmem_limit = _select_tiles(batch_size, cin, cout, n_modes)
    mp = _round_up(n_modes, tl)
    ws = jnp.stack([jnp.real(w), jnp.imag(w)], axis=0).astype(jnp.float32)
    ws = ws.reshape(2, cin, cout, n_modes)
    ws = jnp.pad(ws, ((0, 0), (0, 0), (0, 0), (0, mp - n_modes)))
    meta = dict(batch=batch_size, cin=cin, cout=cout,
                modes1=m1x2 // 2, modes2=m2,
                n_modes=n_modes, mp=mp, tb=tb, tc=tc, tl=tl,
                vmem_limit=vmem_limit)
    return ws, meta


def spectral_conv2d_forward(x, ws_packed, meta):
    """SpectralConv2d forward.  x: (B, Cin, H, W) float32 (NCHW)."""
    B, cin, H, W = x.shape
    m1, m2 = meta["modes1"], meta["modes2"]
    cout, M, Mp = meta["cout"], meta["n_modes"], meta["mp"]
    tb, tc, tl = meta["tb"], meta["tc"], meta["tl"]
    assert cin == meta["cin"] and B % tb == 0

    # TODO(synk): rfft2 / irfft2 have no Pallas equivalent; done with XLA FFT.
    x_ft = jnp.fft.rfft2(x)                                   # (B, Cin, H, Wf) c64

    # Fused low-frequency top + bottom mode block, flattened to the lane axis.
    xm = jnp.concatenate(
        [x_ft[:, :, :m1, :m2], x_ft[:, :, H - m1:, :m2]], axis=2
    ).reshape(B, cin, M)
    xs = jnp.stack([jnp.real(xm), jnp.imag(xm)], axis=0).astype(jnp.float32)
    xs = jnp.pad(xs, ((0, 0), (0, 0), (0, 0), (0, Mp - M)))   # lane-dense padding

    n_lane, n_cout, n_b = Mp // tl, cout // tc, B // tb
    # Batch-tile axis innermost: the weight index_map does not depend on it, so
    # Pallas skips the redundant weight DMA across batch steps (feedback #2).
    # Put the larger of the lane / cout axes first so a 2-TC part (v7x) can
    # shard a parallel axis with extent >= 2 when one exists (feedback #8).
    if n_cout > n_lane:
        grid = (n_cout, n_lane, n_b)
        x_map = lambda c, l, b: (0, b, 0, l)
        w_map = lambda c, l, b: (0, 0, c, l)
        o_map = lambda c, l, b: (0, b, c, l)
    else:
        grid = (n_lane, n_cout, n_b)
        x_map = lambda l, c, b: (0, b, 0, l)
        w_map = lambda l, c, b: (0, 0, c, l)
        o_map = lambda l, c, b: (0, b, c, l)

    ys = pl.pallas_call(
        _spectral_mix_kernel,
        grid=grid,
        in_specs=[
            pl.BlockSpec((2, tb, cin, tl), x_map),
            pl.BlockSpec((2, cin, tc, tl), w_map),
        ],
        out_specs=pl.BlockSpec((2, tb, tc, tl), o_map),
        out_shape=jax.ShapeDtypeStruct((2, B, cout, Mp), jnp.float32),
        compiler_params=pltpu.CompilerParams(
            dimension_semantics=("parallel", "parallel", "parallel"),
            vmem_limit_bytes=meta["vmem_limit"],
        ),
    )(xs, ws_packed)

    # Unpack: drop lane padding, rebuild complex modes, scatter, inverse FFT.
    y = ys[:, :, :, :M].reshape(2, B, cout, 2 * m1, m2)
    yc = (y[0] + 1j * y[1]).astype(jnp.complex64)

    Wf = W // 2 + 1
    # Note: if H < 2*m1 the two slices overlap and the second .set wins —
    # identical behaviour to the PyTorch reference.
    out_ft = jnp.zeros((B, cout, H, Wf), dtype=jnp.complex64)
    out_ft = out_ft.at[:, :, :m1, :m2].set(yc[:, :, :m1])
    out_ft = out_ft.at[:, :, H - m1:, :m2].set(yc[:, :, m1:])
    return jnp.fft.irfft2(out_ft, s=(H, W))                   # (B, Cout, H, W) f32


def _reference_forward(x, weights1, weights2, modes1, modes2):
    """Pure-JAX reference mirroring the PyTorch module exactly."""
    B, Cin, H, W = x.shape
    Cout = weights1.shape[1]
    Wf = W // 2 + 1
    x_ft = jnp.fft.rfft2(x)
    out_ft = jnp.zeros((B, Cout, H, Wf), dtype=jnp.complex64)
    out_ft = out_ft.at[:, :, :modes1, :modes2].set(
        jnp.einsum('bixt,ioxt->boxt', x_ft[:, :, :modes1, :modes2], weights1))
    out_ft = out_ft.at[:, :, H - modes1:, :modes2].set(
        jnp.einsum('bixt,ioxt->boxt', x_ft[:, :, H - modes1:, :modes2], weights2))
    return jnp.fft.irfft2(out_ft, s=(H, W))


if __name__ == "__main__":
    # Module hyperparameters (small, consistent with the forward).
    batch = 2
    in_channels = 4
    out_channels = 4
    H = 16
    W = 16
    modes1 = 4
    modes2 = 4

    key = jax.random.PRNGKey(0)
    kx, kw1r, kw1i, kw2r, kw2i = jax.random.split(key, 5)

    # Input (NCHW, real float32), like the PyTorch module expects.
    x = jax.random.normal(kx, (batch, in_channels, H, W), dtype=jnp.float32)

    # Deterministic parameter init mirroring
    #   scale * torch.rand(in, out, modes1, modes2, dtype=cfloat)
    scale = 1.0 / (in_channels * out_channels)
    wshape = (in_channels, out_channels, modes1, modes2)
    weights1 = (scale * jax.random.uniform(kw1r, wshape, dtype=jnp.float32)
                + 1j * scale * jax.random.uniform(kw1i, wshape, dtype=jnp.float32)
                ).astype(jnp.complex64)
    weights2 = (scale * jax.random.uniform(kw2r, wshape, dtype=jnp.float32)
                + 1j * scale * jax.random.uniform(kw2i, wshape, dtype=jnp.float32)
                ).astype(jnp.complex64)

    # One-time weight packing (lives at module init in a real model, feedback #9).
    ws_packed, meta = pack_spectral_weights(weights1, weights2, batch)
    forward = jax.jit(lambda xx, ww: spectral_conv2d_forward(xx, ww, meta))

    out = jax.block_until_ready(forward(x, ws_packed))
    ref = jax.block_until_ready(
        _reference_forward(x, weights1, weights2, modes1, modes2))

    assert out.shape == (batch, out_channels, H, W), out.shape
    assert jnp.allclose(out, ref, atol=1e-5, rtol=1e-5), \
        float(jnp.max(jnp.abs(out - ref)))

    print("KERNEL_OK")
</pallas_src>

<mosaic_0001>
module attributes {stable_mosaic.version = 11 : i64} {
  func.func @_spectral_mix_kernel(%arg0: i32, %arg1: i32, %arg2: i32, %arg3: memref<2x2x4x128xf32, #tpu.memory_space<vmem>>, %arg4: memref<2x4x4x128xf32, #tpu.memory_space<vmem>>, %arg5: memref<2x2x4x128xf32, #tpu.memory_space<vmem>>) attributes {dimension_semantics = [#tpu.dimension_semantics<parallel>, #tpu.dimension_semantics<parallel>, #tpu.dimension_semantics<parallel>], iteration_bounds = array<i64: 1, 1, 1>, scalar_prefetch = 0 : i64, scratch_operands = 0 : i64, tpu.core_type = #tpu.core_type<tc>, window_params = [{transform_indices = @transform_0, window_bounds = array<i64: 2, 2, 4, 128>}, {transform_indices = @transform_1, window_bounds = array<i64: 2, 4, 4, 128>}, {transform_indices = @transform_2, window_bounds = array<i64: 2, 2, 4, 128>}]} {
    %cst = arith.constant 0.000000e+00 : f32
    %0 = vector.broadcast %cst : f32 to vector<4x128xf32>
    %c0 = arith.constant 0 : index
    %c0_0 = arith.constant 0 : index
    %c0_1 = arith.constant 0 : index
    %c0_2 = arith.constant 0 : index
    %1 = vector.load %arg3[%c0, %c0_0, %c0_1, %c0_2] : memref<2x2x4x128xf32, #tpu.memory_space<vmem>>, vector<1x1x1x128xf32>
    %2 = vector.shape_cast %1 : vector<1x1x1x128xf32> to vector<1x128xf32>
    %c1 = arith.constant 1 : index
    %c0_3 = arith.constant 0 : index
    %c0_4 = arith.constant 0 : index
    %c0_5 = arith.constant 0 : index
    %3 = vector.load %arg3[%c1, %c0_3, %c0_4, %c0_5] : memref<2x2x4x128xf32, #tpu.memory_space<vmem>>, vector<1x1x1x128xf32>
    %4 = vector.shape_cast %3 : vector<1x1x1x128xf32> to vector<1x128xf32>
    %c0_6 = arith.constant 0 : index
    %c0_7 = arith.constant 0 : index
    %c0_8 = arith.constant 0 : index
    %c0_9 = arith.constant 0 : index
    %5 = vector.load %arg4[%c0_6, %c0_7, %c0_8, %c0_9] : memref<2x4x4x128xf32, #tpu.memory_space<vmem>>, vector<1x1x4x128xf32>
    %6 = vector.shape_cast %5 : vector<1x1x4x128xf32> to vector<4x128xf32>
    %c1_10 = arith.constant 1 : index
    %c0_11 = arith.constant 0 : index
    %c0_12 = arith.constant 0 : index
    %c0_13 = arith.constant 0 : index
    %7 = vector.load %arg4[%c1_10, %c0_11, %c0_12, %c0_13] : memref<2x4x4x128xf32, #tpu.memory_space<vmem>>, vector<1x1x4x128xf32>
    %8 = vector.shape_cast %7 : vector<1x1x4x128xf32> to vector<4x128xf32>
    %9 = vector.shape_cast %2 : vector<1x128xf32> to vector<1x128xf32>
    %10 = vector.broadcast %9 : vector<1x128xf32> to vector<4x128xf32>
    %11 = vector.shape_cast %4 : vector<1x128xf32> to vector<1x128xf32>
    %12 = vector.broadcast %11 : vector<1x128xf32> to vector<4x128xf32>
    %13 = arith.mulf %10, %6 : vector<4x128xf32>
    %14 = arith.addf %0, %13 : vector<4x128xf32>
    %15 = arith.mulf %12, %8 : vector<4x128xf32>
    %16 = arith.subf %14, %15 : vector<4x128xf32>
    %17 = arith.mulf %10, %8 : vector<4x128xf32>
    %18 = arith.addf %0, %17 : vector<4x128xf32>
    %19 = arith.mulf %12, %6 : vector<4x128xf32>
    %20 = arith.addf %18, %19 : vector<4x128xf32>
    %c0_14 = arith.constant 0 : index
    %c0_15 = arith.constant 0 : index
    %c1_16 = arith.constant 1 : index
    %c0_17 = arith.constant 0 : index
    %21 = vector.load %arg3[%c0_14, %c0_15, %c1_16, %c0_17] : memref<2x2x4x128xf32, #tpu.memory_space<vmem>>, vector<1x1x1x128xf32>
    %22 = vector.shape_cast %21 : vector<1x1x1x128xf32> to vector<1x128xf32>
    %c1_18 = arith.constant 1 : index
    %c0_19 = arith.constant 0 : index
    %c1_20 = arith.constant 1 : index
    %c0_21 = arith.constant 0 : index
    %23 = vector.load %arg3[%c1_18, %c0_19, %c1_20, %c0_21] : memref<2x2x4x128xf32, #tpu.memory_space<vmem>>, vector<1x1x1x128xf32>
    %24 = vector.shape_cast %23 : vector<1x1x1x128xf32> to vector<1x128xf32>
    %c0_22 = arith.constant 0 : index
    %c1_23 = arith.constant 1 : index
    %c0_24 = arith.constant 0 : index
    %c0_25 = arith.constant 0 : index
    %25 = vector.load %arg4[%c0_22, %c1_23, %c0_24, %c0_25] : memref<2x4x4x128xf32, #tpu.memory_space<vmem>>, vector<1x1x4x128xf32>
    %26 = vector.shape_cast %25 : vector<1x1x4x128xf32> to vector<4x128xf32>
    %c1_26 = arith.constant 1 : index
    %c1_27 = arith.constant 1 : index
    %c0_28 = arith.constant 0 : index
    %c0_29 = arith.constant 0 : index
    %27 = vector.load %arg4[%c1_26, %c1_27, %c0_28, %c0_29] : memref<2x4x4x128xf32, #tpu.memory_space<vmem>>, vector<1x1x4x128xf32>
    %28 = vector.shape_cast %27 : vector<1x1x4x128xf32> to vector<4x128xf32>
    %29 = vector.shape_cast %22 : vector<1x128xf32> to vector<1x128xf32>
    %30 = vector.broadcast %29 : vector<1x128xf32> to vector<4x128xf32>
    %31 = vector.shape_cast %24 : vector<1x128xf32> to vector<1x128xf32>
    %32 = vector.broadcast %31 : vector<1x128xf32> to vector<4x128xf32>
    %33 = arith.mulf %30, %26 : vector<4x128xf32>
    %34 = arith.addf %16, %33 : vector<4x128xf32>
    %35 = arith.mulf %32, %28 : vector<4x128xf32>
    %36 = arith.subf %34, %35 : vector<4x128xf32>
    %37 = arith.mulf %30, %28 : vector<4x128xf32>
    %38 = arith.addf %20, %37 : vector<4x128xf32>
    %39 = arith.mulf %32, %26 : vector<4x128xf32>
    %40 = arith.addf %38, %39 : vector<4x128xf32>
    %c0_30 = arith.constant 0 : index
    %c0_31 = arith.constant 0 : index
    %c2 = arith.constant 2 : index
    %c0_32 = arith.constant 0 : index
    %41 = vector.load %arg3[%c0_30, %c0_31, %c2, %c0_32] : memref<2x2x4x128xf32, #tpu.memory_space<vmem>>, vector<1x1x1x128xf32>
    %42 = vector.shape_cast %41 : vector<1x1x1x128xf32> to vector<1x128xf32>
    %c1_33 = arith.constant 1 : index
    %c0_34 = arith.constant 0 : index
    %c2_35 = arith.constant 2 : index
    %c0_36 = arith.constant 0 : index
    %43 = vector.load %arg3[%c1_33, %c0_34, %c2_35, %c0_36] : memref<2x2x4x128xf32, #tpu.memory_space<vmem>>, vector<1x1x1x128xf32>
    %44 = vector.shape_cast %43 : vector<1x1x1x128xf32> to vector<1x128xf32>
    %c0_37 = arith.constant 0 : index
    %c2_38 = arith.constant 2 : index
    %c0_39 = arith.constant 0 : index
    %c0_40 = arith.constant 0 : index
    %45 = vector.load %arg4[%c0_37, %c2_38, %c0_39, %c0_40] : memref<2x4x4x128xf32, #tpu.memory_space<vmem>>, vector<1x1x4x128xf32>
    %46 = vector.shape_cast %45 : vector<1x1x4x128xf32> to vector<4x128xf32>
    %c1_41 = arith.constant 1 : index
    %c2_42 = arith.constant 2 : index
    %c0_43 = arith.constant 0 : index
    %c0_44 = arith.constant 0 : index
    %47 = vector.load %arg4[%c1_41, %c2_42, %c0_43, %c0_44] : memref<2x4x4x128xf32, #tpu.memory_space<vmem>>, vector<1x1x4x128xf32>
    %48 = vector.shape_cast %47 : vector<1x1x4x128xf32> to vector<4x128xf32>
    %49 = vector.shape_cast %42 : vector<1x128xf32> to vector<1x128xf32>
    %50 = vector.broadcast %49 : vector<1x128xf32> to vector<4x128xf32>
    %51 = vector.shape_cast %44 : vector<1x128xf32> to vector<1x128xf32>
    %52 = vector.broadcast %51 : vector<1x128xf32> to vector<4x128xf32>
    %53 = arith.mulf %50, %46 : vector<4x128xf32>
    %54 = arith.addf %36, %53 : vector<4x128xf32>
    %55 = arith.mulf %52, %48 : vector<4x128xf32>
    %56 = arith.subf %54, %55 : vector<4x128xf32>
    %57 = arith.mulf %50, %48 : vector<4x128xf32>
    %58 = arith.addf %40, %57 : vector<4x128xf32>
    %59 = arith.mulf %52, %46 : vector<4x128xf32>
    %60 = arith.addf %58, %59 : vector<4x128xf32>
    %c0_45 = arith.constant 0 : index
    %c0_46 = arith.constant 0 : index
    %c3 = arith.constant 3 : index
    %c0_47 = arith.constant 0 : index
    %61 = vector.load %arg3[%c0_45, %c0_46, %c3, %c0_47] : memref<2x2x4x128xf32, #tpu.memory_space<vmem>>, vector<1x1x1x128xf32>
    %62 = vector.shape_cast %61 : vector<1x1x1x128xf32> to vector<1x128xf32>
    %c1_48 = arith.constant 1 : index
    %c0_49 = arith.constant 0 : index
    %c3_50 = arith.constant 3 : index
    %c0_51 = arith.constant 0 : index
    %63 = vector.load %arg3[%c1_48, %c0_49, %c3_50, %c0_51] : memref<2x2x4x128xf32, #tpu.memory_space<vmem>>, vector<1x1x1x128xf32>
    %64 = vector.shape_cast %63 : vector<1x1x1x128xf32> to vector<1x128xf32>
    %c0_52 = arith.constant 0 : index
    %c3_53 = arith.constant 3 : index
    %c0_54 = arith.constant 0 : index
    %c0_55 = arith.constant 0 : index
    %65 = vector.load %arg4[%c0_52, %c3_53, %c0_54, %c0_55] : memref<2x4x4x128xf32, #tpu.memory_space<vmem>>, vector<1x1x4x128xf32>
    %66 = vector.shape_cast %65 : vector<1x1x4x128xf32> to vector<4x128xf32>
    %c1_56 = arith.constant 1 : index
    %c3_57 = arith.constant 3 : index
    %c0_58 = arith.constant 0 : index
    %c0_59 = arith.constant 0 : index
    %67 = vector.load %arg4[%c1_56, %c3_57, %c0_58, %c0_59] : memref<2x4x4x128xf32, #tpu.memory_space<vmem>>, vector<1x1x4x128xf32>
    %68 = vector.shape_cast %67 : vector<1x1x4x128xf32> to vector<4x128xf32>
    %69 = vector.shape_cast %62 : vector<1x128xf32> to vector<1x128xf32>
    %70 = vector.broadcast %69 : vector<1x128xf32> to vector<4x128xf32>
    %71 = vector.shape_cast %64 : vector<1x128xf32> to vector<1x128xf32>
    %72 = vector.broadcast %71 : vector<1x128xf32> to vector<4x128xf32>
    %73 = arith.mulf %70, %66 : vector<4x128xf32>
    %74 = arith.addf %56, %73 : vector<4x128xf32>
    %75 = arith.mulf %72, %68 : vector<4x128xf32>
    %76 = arith.subf %74, %75 : vector<4x128xf32>
    %77 = arith.mulf %70, %68 : vector<4x128xf32>
    %78 = arith.addf %60, %77 : vector<4x128xf32>
    %79 = arith.mulf %72, %66 : vector<4x128xf32>
    %80 = arith.addf %78, %79 : vector<4x128xf32>
    %c0_60 = arith.constant 0 : index
    %c0_61 = arith.constant 0 : index
    %c0_62 = arith.constant 0 : index
    %c0_63 = arith.constant 0 : index
    %81 = vector.load %arg5[%c0_60, %c0_61, %c0_62, %c0_63] : memref<2x2x4x128xf32, #tpu.memory_space<vmem>>, vector<1x1x4x128xf32>
    %82 = vector.shape_cast %81 : vector<1x1x4x128xf32> to vector<4x128xf32>
    %83 = vector.shape_cast %76 : vector<4x128xf32> to vector<1x1x4x128xf32>
    tpu.vector_store %arg5[%c0_60, %c0_61, %c0_62, %c0_63], %83 {strides = array<i32>} : memref<2x2x4x128xf32, #tpu.memory_space<vmem>>, vector<1x1x4x128xf32>,
    %c1_64 = arith.constant 1 : index
    %c0_65 = arith.constant 0 : index
    %c0_66 = arith.constant 0 : index
    %c0_67 = arith.constant 0 : index
    %84 = vector.load %arg5[%c1_64, %c0_65, %c0_66, %c0_67] : memref<2x2x4x128xf32, #tpu.memory_space<vmem>>, vector<1x1x4x128xf32>
    %85 = vector.shape_cast %84 : vector<1x1x4x128xf32> to vector<4x128xf32>
    %86 = vector.shape_cast %80 : vector<4x128xf32> to vector<1x1x4x128xf32>
    tpu.vector_store %arg5[%c1_64, %c0_65, %c0_66, %c0_67], %86 {strides = array<i32>} : memref<2x2x4x128xf32, #tpu.memory_space<vmem>>, vector<1x1x4x128xf32>,
    %cst_68 = arith.constant 0.000000e+00 : f32
    %87 = vector.broadcast %cst_68 : f32 to vector<4x128xf32>
    %c0_69 = arith.constant 0 : index
    %c1_70 = arith.constant 1 : index
    %c0_71 = arith.constant 0 : index
    %c0_72 = arith.constant 0 : index
    %88 = vector.load %arg3[%c0_69, %c1_70, %c0_71, %c0_72] : memref<2x2x4x128xf32, #tpu.memory_space<vmem>>, vector<1x1x1x128xf32>
    %89 = vector.shape_cast %88 : vector<1x1x1x128xf32> to vector<1x128xf32>
    %c1_73 = arith.constant 1 : index
    %c1_74 = arith.constant 1 : index
    %c0_75 = arith.constant 0 : index
    %c0_76 = arith.constant 0 : index
    %90 = vector.load %arg3[%c1_73, %c1_74, %c0_75, %c0_76] : memref<2x2x4x128xf32, #tpu.memory_space<vmem>>, vector<1x1x1x128xf32>
    %91 = vector.shape_cast %90 : vector<1x1x1x128xf32> to vector<1x128xf32>
    %c0_77 = arith.constant 0 : index
    %c0_78 = arith.constant 0 : index
    %c0_79 = arith.constant 0 : index
    %c0_80 = arith.constant 0 : index
    %92 = vector.load %arg4[%c0_77, %c0_78, %c0_79, %c0_80] : memref<2x4x4x128xf32, #tpu.memory_space<vmem>>, vector<1x1x4x128xf32>
    %93 = vector.shape_cast %92 : vector<1x1x4x128xf32> to vector<4x128xf32>
    %c1_81 = arith.constant 1 : index
    %c0_82 = arith.constant 0 : index
    %c0_83 = arith.constant 0 : index
    %c0_84 = arith.constant 0 : index
    %94 = vector.load %arg4[%c1_81, %c0_82, %c0_83, %c0_84] : memref<2x4x4x128xf32, #tpu.memory_space<vmem>>, vector<1x1x4x128xf32>
    %95 = vector.shape_cast %94 : vector<1x1x4x128xf32> to vector<4x128xf32>
    %96 = vector.shape_cast %89 : vector<1x128xf32> to vector<1x128xf32>
    %97 = vector.broadcast %96 : vector<1x128xf32> to vector<4x128xf32>
    %98 = vector.shape_cast %91 : vector<1x128xf32> to vector<1x128xf32>
    %99 = vector.broadcast %98 : vector<1x128xf32> to vector<4x128xf32>
    %100 = arith.mulf %97, %93 : vector<4x128xf32>
    %101 = arith.addf %87, %100 : vector<4x128xf32>
    %102 = arith.mulf %99, %95 : vector<4x128xf32>
    %103 = arith.subf %101, %102 : vector<4x128xf32>
    %104 = arith.mulf %97, %95 : vector<4x128xf32>
    %105 = arith.addf %87, %104 : vector<4x128xf32>
    %106 = arith.mulf %99, %93 : vector<4x128xf32>
    %107 = arith.addf %105, %106 : vector<4x128xf32>
    %c0_85 = arith.constant 0 : index
    %c1_86 = arith.constant 1 : index
    %c1_87 = arith.constant 1 : index
    %c0_88 = arith.constant 0 : index
    %108 = vector.load %arg3[%c0_85, %c1_86, %c1_87, %c0_88] : memref<2x2x4x128xf32, #tpu.memory_space<vmem>>, vector<1x1x1x128xf32>
    %109 = vector.shape_cast %108 : vector<1x1x1x128xf32> to vector<1x128xf32>
    %c1_89 = arith.constant 1 : index
    %c1_90 = arith.constant 1 : index
    %c1_91 = arith.constant 1 : index
    %c0_92 = arith.constant 0 : index
    %110 = vector.load %arg3[%c1_89, %c1_90, %c1_91, %c0_92] : memref<2x2x4x128xf32, #tpu.memory_space<vmem>>, vector<1x1x1x128xf32>
    %111 = vector.shape_cast %110 : vector<1x1x1x128xf32> to vector<1x128xf32>
    %c0_93 = arith.constant 0 : index
    %c1_94 = arith.constant 1 : index
    %c0_95 = arith.constant 0 : index
    %c0_96 = arith.constant 0 : index
    %112 = vector.load %arg4[%c0_93, %c1_94, %c0_95, %c0_96] : memref<2x4x4x128xf32, #tpu.memory_space<vmem>>, vector<1x1x4x128xf32>
    %113 = vector.shape_cast %112 : vector<1x1x4x128xf32> to vector<4x128xf32>
    %c1_97 = arith.constant 1 : index
    %c1_98 = arith.constant 1 : index
    %c0_99 = arith.constant 0 : index
    %c0_100 = arith.constant 0 : index
    %114 = vector.load %arg4[%c1_97, %c1_98, %c0_99, %c0_100] : memref<2x4x4x128xf32, #tpu.memory_space<vmem>>, vector<1x1x4x128xf32>
    %115 = vector.shape_cast %114 : vector<1x1x4x128xf32> to vector<4x128xf32>
    %116 = vector.shape_cast %109 : vector<1x128xf32> to vector<1x128xf32>
    %117 = vector.broadcast %116 : vector<1x128xf32> to vector<4x128xf32>
    %118 = vector.shape_cast %111 : vector<1x128xf32> to vector<1x128xf32>
    %119 = vector.broadcast %118 : vector<1x128xf32> to vector<4x128xf32>
    %120 = arith.mulf %117, %113 : vector<4x128xf32>
    %121 = arith.addf %103, %120 : vector<4x128xf32>
    %122 = arith.mulf %119, %115 : vector<4x128xf32>
    %123 = arith.subf %121, %122 : vector<4x128xf32>
    %124 = arith.mulf %117, %115 : vector<4x128xf32>
    %125 = arith.addf %107, %124 : vector<4x128xf32>
    %126 = arith.mulf %119, %113 : vector<4x128xf32>
    %127 = arith.addf %125, %126 : vector<4x128xf32>
    %c0_101 = arith.constant 0 : index
    %c1_102 = arith.constant 1 : index
    %c2_103 = arith.constant 2 : index
    %c0_104 = arith.constant 0 : index
    %128 = vector.load %arg3[%c0_101, %c1_102, %c2_103, %c0_104] : memref<2x2x4x128xf32, #tpu.memory_space<vmem>>, vector<1x1x1x128xf32>
    %129 = vector.shape_cast %128 : vector<1x1x1x128xf32> to vector<1x128xf32>
    %c1_105 = arith.constant 1 : index
    %c1_106 = arith.constant 1 : index
    %c2_107 = arith.constant 2 : index
    %c0_108 = arith.constant 0 : index
    %130 = vector.load %arg3[%c1_105, %c1_106, %c2_107, %c0_108] : memref<2x2x4x128xf32, #tpu.memory_space<vmem>>, vector<1x1x1x128xf32>
    %131 = vector.shape_cast %130 : vector<1x1x1x128xf32> to vector<1x128xf32>
    %c0_109 = arith.constant 0 : index
    %c2_110 = arith.constant 2 : index
    %c0_111 = arith.constant 0 : index
    %c0_112 = arith.constant 0 : index
    %132 = vector.load %arg4[%c0_109, %c2_110, %c0_111, %c0_112] : memref<2x4x4x128xf32, #tpu.memory_space<vmem>>, vector<1x1x4x128xf32>
    %133 = vector.shape_cast %132 : vector<1x1x4x128xf32> to vector<4x128xf32>
    %c1_113 = arith.constant 1 : index
    %c2_114 = arith.constant 2 : index
    %c0_115 = arith.constant 0 : index
    %c0_116 = arith.constant 0 : index
    %134 = vector.load %arg4[%c1_113, %c2_114, %c0_115, %c0_116] : memref<2x4x4x128xf32, #tpu.memory_space<vmem>>, vector<1x1x4x128xf32>
    %135 = vector.shape_cast %134 : vector<1x1x4x128xf32> to vector<4x128xf32>
    %136 = vector.shape_cast %129 : vector<1x128xf32> to vector<1x128xf32>
    %137 = vector.broadcast %136 : vector<1x128xf32> to vector<4x128xf32>
    %138 = vector.shape_cast %131 : vector<1x128xf32> to vector<1x128xf32>
    %139 = vector.broadcast %138 : vector<1x128xf32> to vector<4x128xf32>
    %140 = arith.mulf %137, %133 : vector<4x128xf32>
    %141 = arith.addf %123, %140 : vector<4x128xf32>
    %142 = arith.mulf %139, %135 : vector<4x128xf32>
    %143 = arith.subf %141, %142 : vector<4x128xf32>
    %144 = arith.mulf %137, %135 : vector<4x128xf32>
    %145 = arith.addf %127, %144 : vector<4x128xf32>
    %146 = arith.mulf %139, %133 : vector<4x128xf32>
    %147 = arith.addf %145, %146 : vector<4x128xf32>
    %c0_117 = arith.constant 0 : index
    %c1_118 = arith.constant 1 : index
    %c3_119 = arith.constant 3 : index
    %c0_120 = arith.constant 0 : index
    %148 = vector.load %arg3[%c0_117, %c1_118, %c3_119, %c0_120] : memref<2x2x4x128xf32, #tpu.memory_space<vmem>>, vector<1x1x1x128xf32>
    %149 = vector.shape_cast %148 : vector<1x1x1x128xf32> to vector<1x128xf32>
    %c1_121 = arith.constant 1 : index
    %c1_122 = arith.constant 1 : index
    %c3_123 = arith.constant 3 : index
    %c0_124 = arith.constant 0 : index
    %150 = vector.load %arg3[%c1_121, %c1_122, %c3_123, %c0_124] : memref<2x2x4x128xf32, #tpu.memory_space<vmem>>, vector<1x1x1x128xf32>
    %151 = vector.shape_cast %150 : vector<1x1x1x128xf32> to vector<1x128xf32>
    %c0_125 = arith.constant 0 : index
    %c3_126 = arith.constant 3 : index
    %c0_127 = arith.constant 0 : index
    %c0_128 = arith.constant 0 : index
    %152 = vector.load %arg4[%c0_125, %c3_126, %c0_127, %c0_128] : memref<2x4x4x128xf32, #tpu.memory_space<vmem>>, vector<1x1x4x128xf32>
    %153 = vector.shape_cast %152 : vector<1x1x4x128xf32> to vector<4x128xf32>
    %c1_129 = arith.constant 1 : index
    %c3_130 = arith.constant 3 : index
    %c0_131 = arith.constant 0 : index
    %c0_132 = arith.constant 0 : index
    %154 = vector.load %arg4[%c1_129, %c3_130, %c0_131, %c0_132] : memref<2x4x4x128xf32, #tpu.memory_space<vmem>>, vector<1x1x4x128xf32>
    %155 = vector.shape_cast %154 : vector<1x1x4x128xf32> to vector<4x128xf32>
    %156 = vector.shape_cast %149 : vector<1x128xf32> to vector<1x128xf32>
    %157 = vector.broadcast %156 : vector<1x128xf32> to vector<4x128xf32>
    %158 = vector.shape_cast %151 : vector<1x128xf32> to vector<1x128xf32>
    %159 = vector.broadcast %158 : vector<1x128xf32> to vector<4x128xf32>
    %160 = arith.mulf %157, %153 : vector<4x128xf32>
    %161 = arith.addf %143, %160 : vector<4x128xf32>
    %162 = arith.mulf %159, %155 : vector<4x128xf32>
    %163 = arith.subf %161, %162 : vector<4x128xf32>
    %164 = arith.mulf %157, %155 : vector<4x128xf32>
    %165 = arith.addf %147, %164 : vector<4x128xf32>
    %166 = arith.mulf %159, %153 : vector<4x128xf32>
    %167 = arith.addf %165, %166 : vector<4x128xf32>
    %c0_133 = arith.constant 0 : index
    %c1_134 = arith.constant 1 : index
    %c0_135 = arith.constant 0 : index
    %c0_136 = arith.constant 0 : index
    %168 = vector.load %arg5[%c0_133, %c1_134, %c0_135, %c0_136] : memref<2x2x4x128xf32, #tpu.memory_space<vmem>>, vector<1x1x4x128xf32>
    %169 = vector.shape_cast %168 : vector<1x1x4x128xf32> to vector<4x128xf32>
    %170 = vector.shape_cast %163 : vector<4x128xf32> to vector<1x1x4x128xf32>
    tpu.vector_store %arg5[%c0_133, %c1_134, %c0_135, %c0_136], %170 {strides = array<i32>} : memref<2x2x4x128xf32, #tpu.memory_space<vmem>>, vector<1x1x4x128xf32>,
    %c1_137 = arith.constant 1 : index
    %c1_138 = arith.constant 1 : index
    %c0_139 = arith.constant 0 : index
    %c0_140 = arith.constant 0 : index
    %171 = vector.load %arg5[%c1_137, %c1_138, %c0_139, %c0_140] : memref<2x2x4x128xf32, #tpu.memory_space<vmem>>, vector<1x1x4x128xf32>
    %172 = vector.shape_cast %171 : vector<1x1x4x128xf32> to vector<4x128xf32>
    %173 = vector.shape_cast %167 : vector<4x128xf32> to vector<1x1x4x128xf32>
    tpu.vector_store %arg5[%c1_137, %c1_138, %c0_139, %c0_140], %173 {strides = array<i32>} : memref<2x2x4x128xf32, #tpu.memory_space<vmem>>, vector<1x1x4x128xf32>,
    return
  }
  func.func @transform_0(%arg0: i32, %arg1: i32, %arg2: i32) -> (i32, i32, i32, i32) {
    %c0_i32 = arith.constant 0 : i32
    %c0_i32_0 = arith.constant 0 : i32
    %c0_i32_1 = arith.constant 0 : i32
    return %c0_i32, %arg2, %c0_i32_0, %arg0 : i32, i32, i32, i32
  }
  func.func @transform_1(%arg0: i32, %arg1: i32, %arg2: i32) -> (i32, i32, i32, i32) {
    %c0_i32 = arith.constant 0 : i32
    %c0_i32_0 = arith.constant 0 : i32
    %c0_i32_1 = arith.constant 0 : i32
    return %c0_i32, %c0_i32_0, %arg1, %arg0 : i32, i32, i32, i32
  }
  func.func @transform_2(%arg0: i32, %arg1: i32, %arg2: i32) -> (i32, i32, i32, i32) {
    %c0_i32 = arith.constant 0 : i32
    %c0_i32_0 = arith.constant 0 : i32
    return %c0_i32, %arg2, %arg1, %arg0 : i32, i32, i32, i32
  }
}

</mosaic_0001>

<bundles_post_ra>
// kernel: squeeze.2
= control target key start
LH: loop header
LB: loop body
LE: loop exit
PB: predicated region body
PF: predicated region fallthrough
CT: control target
= control target key end

     0   :  { %vm11_vm0 = vcmask 31744   ;;  %s98_s12 = smov 116   ;;  %s99_s15 = smov 120   ;;  %s184_s0 = inlined_call_operand.vmem [shape: f32[1,2,4,32], index: 0, kind: input, shape index: {}]   ;;  %s185_s1 = inlined_call_operand.vmem [shape: f32[2,4,8,4], index: 1, kind: output, shape index: {}]  }
   0x1   :  { %v74_v0 = vld [vmem:[%s184_s0 + $0x4] sm:$0xf]  ;;  %v8_v1 = vld [vmem:[%s184_s0] sm:$0xf]  ;;  %s97_s0 = smov 124   ;;  %s100_s16 = smov 112  }
   0x2   :  { %7 = vst [vmem:[#allocation0 + $0x8] sm:$0xf] %v74_v0  ;;  %9 = vst [vmem:[#allocation0] sm:$0xf] %v8_v1  ;;  %s101_s17 = smov 108   ;;  %s102_s18 = smov 104  }
   0x3   :  { %s103_s19 = smov 100  }
   0x9   :  { %v18_v2 = vld.sshfl [vmem:[#allocation0] sm:$0xff pattern:$0xba983210]  }
   0xa   :  { %v10_v3 = vld [vmem:[#allocation0] sm:$0xf]   ;;  %19 = vrot.lane.b32.xlu0 %v18_v2, %s97_s0  ;;  %35 = vrot.lane.b32.xlu1 %v18_v2, %s98_s12  ;;  %v14_v4 = vld [vmem:[#allocation0 + $0x8] sm:$0xf]  }
   0xb   :  { %12 = vst.msk [vmem:[%s185_s1] ss:$8 sm:$0xf] %vm11_vm0, %v10_v3   ;;  %75 = vst.msk [vmem:[%s185_s1 + $0x20] ss:$8 sm:$0xf] %vm11_vm0, %v14_v4  }
   0xe   :  { %27 = vrot.lane.b32.xlu0 %v18_v2, %s99_s15  ;;  %43 = vrot.lane.b32.xlu1 %v18_v2, %s100_s16 }
  0x12   :  { %51 = vrot.lane.b32.xlu0 %v18_v2, %s101_s17  ;;  %59 = vrot.lane.b32.xlu1 %v18_v2, %s102_s18 }
  0x16   :  { %67 = vrot.lane.b32.xlu0 %v18_v2, %s103_s19 }
  0x7c   :  { %v20_v5 = vpop.permute.xlu0 %19   ;;  %v36_v6 = vpop.permute.xlu1 %35  }
  0x7d   :  { %76 = vst.msk [vmem:[%s185_s1 + $0x1] ss:$8 sm:$0xf] %vm11_vm0, %v20_v5   ;;  %77 = vst.msk [vmem:[%s185_s1 + $0x1] ss:$8 sm:$0xf0] %vm11_vm0, %v20_v5  }
  0x7e   :  { %80 = vst.msk [vmem:[%s185_s1 + $0x3] ss:$8 sm:$0xf] %vm11_vm0, %v36_v6   ;;  %81 = vst.msk [vmem:[%s185_s1 + $0x3] ss:$8 sm:$0xf0] %vm11_vm0, %v36_v6  }
  0x80   :  { %v28_v7 = vpop.permute.xlu0 %27   ;;  %v44_v8 = vpop.permute.xlu1 %43  }
  0x81   :  { %78 = vst.msk [vmem:[%s185_s1 + $0x2] ss:$8 sm:$0xf] %vm11_vm0, %v28_v7   ;;  %79 = vst.msk [vmem:[%s185_s1 + $0x2] ss:$8 sm:$0xf0] %vm11_vm0, %v28_v7  }
  0x82   :  { %82 = vst.msk [vmem:[%s185_s1 + $0x4] ss:$8 sm:$0xf] %vm11_vm0, %v44_v8   ;;  %83 = vst.msk [vmem:[%s185_s1 + $0x4] ss:$8 sm:$0xf0] %vm11_vm0, %v44_v8  }
  0x84   :  { %v52_v9 = vpop.permute.xlu0 %51   ;;  %v60_v10 = vpop.permute.xlu1 %59  }
  0x85   :  { %84 = vst.msk [vmem:[%s185_s1 + $0x5] ss:$8 sm:$0xf] %vm11_vm0, %v52_v9   ;;  %85 = vst.msk [vmem:[%s185_s1 + $0x5] ss:$8 sm:$0xf0] %vm11_vm0, %v52_v9  }
  0x86   :  { %86 = vst.msk [vmem:[%s185_s1 + $0x6] ss:$8 sm:$0xf] %vm11_vm0, %v60_v10   ;;  %87 = vst.msk [vmem:[%s185_s1 + $0x6] ss:$8 sm:$0xf0] %vm11_vm0, %v60_v10  }
  0x88   :  { %v68_v11 = vpop.permute.xlu0 %67  }
  0x89   :  { %88 = vst.msk [vmem:[%s185_s1 + $0x7] ss:$8 sm:$0xf] %vm11_vm0, %v68_v11   ;;  %89 = vst.msk [vmem:[%s185_s1 + $0x7] ss:$8 sm:$0xf0] %vm11_vm0, %v68_v11  }

// kernel: _lambda_.1
= control target key start
LH: loop header
LB: loop body
LE: loop exit
PB: predicated region body
PF: predicated region fallthrough
CT: control target
= control target key end

     0   :  { %s360_s0 = inlined_call_operand.vmem [shape: f32[2,2,4,128], index: 0, kind: input, shape index: {}]   ;;  %s361_s1 = inlined_call_operand.vmem [shape: f32[2,4,4,128], index: 1, kind: input, shape index: {}]   ;;  %s362_s2 = inlined_call_operand.vmem [shape: f32[2,2,4,128], index: 2, kind: output, shape index: {}]  }
   0x1   :  { %v194_v0 = vld [vmem:[%s360_s0] ss:$0 sm:$0xff]  ;;  %v195_v1 = vld [vmem:[%s360_s0 + $0x8] ss:$0 sm:$0xff]  ;;  %v193_v3 = vld [vmem:[%s361_s1 + $0x10] sm:$0xf] }
   0x2   :  { %v14_v2 = vld [vmem:[%s361_s1] sm:$0xf]  ;;  %v200_v6 = vld [vmem:[%s360_s0 + $0x9] ss:$0 sm:$0xff]  ;;  %v27_v8 = vmul.f32 %v195_v1, %v193_v3  ;;  %v197_v9 = vld [vmem:[%s361_s1 + $0x4] sm:$0xf]  ;;  %v29_v12 = vmul.f32 %v194_v0, %v193_v3 }
   0x3   :  { %v25_v4 = vmul.f32 %v194_v0, %v14_v2  ;;  %v199_v5 = vld [vmem:[%s360_s0 + $0x1] ss:$0 sm:$0xff]  ;;  %v31_v7 = vmul.f32 %v195_v1, %v14_v2  ;;  %v198_v10 = vld [vmem:[%s361_s1 + $0x14] sm:$0xf]  ;;  %v204_v11 = vld [vmem:[%s360_s0 + $0x2] ss:$0 sm:$0xff]  ;;  %v53_v23 = vmul.f32 %v200_v6, %v197_v9 }
   0x4   :  { %v47_v13 = vmul.f32 %v199_v5, %v197_v9  ;;  %v205_v14 = vld [vmem:[%s360_s0 + $0xa] ss:$0 sm:$0xff]  ;;  %v203_v16 = vld [vmem:[%s361_s1 + $0x18] sm:$0xf]  ;;  %v51_v17 = vmul.f32 %v199_v5, %v198_v10  ;;  %v49_v19 = vmul.f32 %v200_v6, %v198_v10  ;;  %v209_v20 = vld [vmem:[%s360_s0 + $0x3] ss:$0 sm:$0xff] }
   0x5   :  { %v202_v15 = vld [vmem:[%s361_s1 + $0x8] sm:$0xf]  ;;  %v28_v18 = vsub.f32 %v25_v4, %v27_v8  ;;  %v207_v21 = vld [vmem:[%s361_s1 + $0xc] sm:$0xf]  ;;  %v32_v22 = vadd.f32 %v31_v7, %v29_v12  ;;  %v71_v25 = vmul.f32 %v205_v14, %v203_v16  ;;  %v208_v26 = vld [vmem:[%s361_s1 + $0x1c] sm:$0xf]  ;;  %v73_v32 = vmul.f32 %v204_v11, %v203_v16 }
   0x6   :  { %v69_v24 = vmul.f32 %v204_v11, %v202_v15  ;;  %v215_v27 = vld [vmem:[%s360_s0 + $0x4] ss:$0 sm:$0xff]  ;;  %v216_v28 = vld [vmem:[%s360_s0 + $0xc] ss:$0 sm:$0xff]  ;;  %v91_v30 = vmul.f32 %v209_v20, %v207_v21  ;;  %v106_v33 = vld [vmem:[%s361_s1] sm:$0xf]  ;;  %v75_v46 = vmul.f32 %v205_v14, %v202_v15  ;;  %v95_v57 = vmul.f32 %v209_v20, %v208_v26 }
   0x7   :  { %v48_v29 = vadd.f32 %v47_v13, %v28_v18  ;;  %v52_v31 = vadd.f32 %v51_v17, %v32_v22  ;;  %v214_v34 = vld [vmem:[%s361_s1 + $0x10] sm:$0xf]  ;;  %v221_v35 = vld [vmem:[%s360_s0 + $0x5] ss:$0 sm:$0xff]  ;;  %v116_v36 = vmul.f32 %v215_v27, %v106_v33  ;;  %v222_v38 = vld [vmem:[%s360_s0 + $0xd] ss:$0 sm:$0xff]  ;;  %v122_v42 = vmul.f32 %v216_v28, %v106_v33 }
   0x8   :  { %v118_v37 = vmul.f32 %v216_v28, %v214_v34  ;;  %v219_v39 = vld [vmem:[%s361_s1 + $0x4] sm:$0xf]  ;;  %v220_v40 = vld [vmem:[%s361_s1 + $0x14] sm:$0xf]  ;;  %v120_v41 = vmul.f32 %v215_v27, %v214_v34  ;;  %v210_v44 = vld [vmem:[%s360_s0 + $0xb] ss:$0 sm:$0xff] }
   0x9   :  { %v50_v43 = vsub.f32 %v48_v29, %v49_v19  ;;  %v54_v45 = vadd.f32 %v53_v23, %v52_v31  ;;  %v136_v47 = vmul.f32 %v221_v35, %v219_v39  ;;  %v227_v48 = vld [vmem:[%s360_s0 + $0x6] ss:$0 sm:$0xff]  ;;  %v225_v49 = vld [vmem:[%s361_s1 + $0x8] sm:$0xf]  ;;  %v138_v51 = vmul.f32 %v222_v38, %v220_v40  ;;  %v226_v52 = vld [vmem:[%s361_s1 + $0x18] sm:$0xf] }
   0xa   :  { %v119_v50 = vsub.f32 %v116_v36, %v118_v37  ;;  %v123_v53 = vadd.f32 %v122_v42, %v120_v41  ;;  %v140_v54 = vmul.f32 %v221_v35, %v220_v40  ;;  %v228_v58 = vld [vmem:[%s360_s0 + $0xe] ss:$0 sm:$0xff]  ;;  %v142_v59 = vmul.f32 %v222_v38, %v219_v39  ;;  %v233_v3 = vld [vmem:[%s360_s0 + $0x7] ss:$0 sm:$0xff]  ;;  %v232_v5 = vld [vmem:[%s361_s1 + $0x1c] sm:$0xf] }
   0xb   :  { %v70_v55 = vadd.f32 %v69_v24, %v50_v43  ;;  %v74_v56 = vadd.f32 %v73_v32, %v54_v45  ;;  %v97_v60 = vmul.f32 %v210_v44, %v207_v21  ;;  %v156_v62 = vmul.f32 %v227_v48, %v225_v49  ;;  %v231_v4 = vld [vmem:[%s361_s1 + $0xc] sm:$0xf] }
   0xc   :  { %v137_v61 = vadd.f32 %v136_v47, %v119_v50  ;;  %v141_v63 = vadd.f32 %v140_v54, %v123_v53  ;;  %v93_v1 = vmul.f32 %v210_v44, %v208_v26  ;;  %v160_v6 = vmul.f32 %v227_v48, %v226_v52  ;;  %v234_v13 = vld [vmem:[%s360_s0 + $0xf] ss:$0 sm:$0xff] }
   0xd   :  { %v72_v0 = vsub.f32 %v70_v55, %v71_v25  ;;  %v76_v2 = vadd.f32 %v75_v46, %v74_v56  ;;  %v158_v8 = vmul.f32 %v228_v58, %v226_v52  ;;  %v162_v10 = vmul.f32 %v228_v58, %v225_v49 }
   0xe   :  { %v139_v7 = vsub.f32 %v137_v61, %v138_v51  ;;  %v143_v9 = vadd.f32 %v142_v59, %v141_v63  ;;  %v176_v15 = vmul.f32 %v233_v3, %v231_v4  ;;  %v180_v17 = vmul.f32 %v233_v3, %v232_v5 }
   0xf   :  { %v92_v11 = vadd.f32 %v91_v30, %v72_v0  ;;  %v96_v12 = vadd.f32 %v95_v57, %v76_v2  ;;  %v178_v21 = vmul.f32 %v234_v13, %v232_v5  ;;  %v182_v23 = vmul.f32 %v234_v13, %v231_v4 }
  0x10   :  { %v157_v14 = vadd.f32 %v156_v62, %v139_v7  ;;  %v161_v16 = vadd.f32 %v160_v6, %v143_v9 }
  0x11   :  { %v94_v18 = vsub.f32 %v92_v11, %v93_v1  ;;  %v98_v19 = vadd.f32 %v97_v60, %v96_v12 }
  0x12   :  { %v159_v20 = vsub.f32 %v157_v14, %v158_v8  ;;  %v163_v22 = vadd.f32 %v162_v10, %v161_v16 }
  0x13   :  { %99 = vst [vmem:[%s362_s2] sm:$0xf] %v94_v18  ;;  %211 = vst [vmem:[%s362_s2 + $0x8] sm:$0xf] %v98_v19 }
  0x14   :  { %v177_v24 = vadd.f32 %v176_v15, %v159_v20  ;;  %v181_v25 = vadd.f32 %v180_v17, %v163_v22 }
  0x16   :  { %v179_v26 = vsub.f32 %v177_v24, %v178_v21  ;;  %v183_v27 = vadd.f32 %v182_v23, %v181_v25 }
  0x18   :  { %235 = vst [vmem:[%s362_s2 + $0x4] sm:$0xf] %v179_v26  ;;  %236 = vst [vmem:[%s362_s2 + $0xc] sm:$0xf] %v183_v27 }

// kernel: reverse.1
= control target key start
LH: loop header
LB: loop body
LE: loop exit
PB: predicated region body
PF: predicated region fallthrough
CT: control target
= control target key end

     0   :  { %v71_v3 = vlaneseq  ;;  %v64_v9 = vld [vmem:[#allocation0 + $0x7] ss:$-1 sm:$0xff]  ;;  %v78_v12 = vld [vmem:[#allocation0 + $0x17] ss:$-1 sm:$0xff]  ;;  %s329_s0 = inlined_call_operand.vmem [shape: f32[2,4,16,7], index: 0, kind: input, shape index: {}]   ;;  %s330_s1 = inlined_call_operand.vmem [shape: f32[2,4,16,7], index: 1, kind: output, shape index: {}]  }
   0x1   :  { %v44_v0 = vld [vmem:[%s329_s0] sm:$0xff]  ;;  %v46_v1 = vld [vmem:[%s329_s0 + $0x8] sm:$0xff]  ;;  %v48_v2 = vld [vmem:[%s329_s0 + $0x10] sm:$0xff]  ;;  %v65_v10 = vrot.slane %v64_v9, 1  ;;  %v79_v14 = vrot.slane %v78_v12, 1 }
   0x2   :  { %45 = vst [vmem:[#allocation0 + $0x8] sm:$0xff] %v44_v0  ;;  %47 = vst [vmem:[#allocation0 + $0x18] sm:$0xff] %v46_v1  ;;  %v50_v4 = vld [vmem:[%s329_s0 + $0x18] sm:$0xff]  ;;  %v52_v5 = vld [vmem:[%s329_s0 + $0x20] sm:$0xff]  ;;  %v72_v11 = vshrl.u32 %v71_v3, 7 }
   0x3   :  { %49 = vst [vmem:[#allocation0 + $0x28] sm:$0xff] %v48_v2  ;;  %v54_v6 = vld [vmem:[%s329_s0 + $0x28] sm:$0xff]  ;;  %51 = vst [vmem:[#allocation0 + $0x38] sm:$0xff] %v50_v4  ;;  %v56_v7 = vld [vmem:[%s329_s0 + $0x30] sm:$0xff] }
   0x4   :  { %53 = vst [vmem:[#allocation0 + $0x48] sm:$0xff] %v52_v5  ;;  %55 = vst [vmem:[#allocation0 + $0x58] sm:$0xff] %v54_v6  ;;  %v58_v8 = vld [vmem:[%s329_s0 + $0x38] sm:$0xff]  ;;  %v92_v13 = vld [vmem:[#allocation0 + $0x27] ss:$-1 sm:$0xff]  ;;  %vm73_vm0 = vcmp.lt.s32.totalorder %v72_v11, 7 }
   0x5   :  { %57 = vst [vmem:[#allocation0 + $0x68] sm:$0xff] %v56_v7  ;;  %59 = vst [vmem:[#allocation0 + $0x78] sm:$0xff] %v58_v8  ;;  %v93_v15 = vrot.slane %v92_v13, 1  ;;  %v106_v16 = vld [vmem:[#allocation0 + $0x37] ss:$-1 sm:$0xff] }
   0x6   :  { %66 = vst [vmem:[#allocation1] sm:$0xff] %v65_v10  ;;  %v107_v17 = vrot.slane %v106_v16, 1  ;;  %v120_v18 = vld [vmem:[#allocation0 + $0x47] ss:$-1 sm:$0xff]  ;;  %v134_v19 = vld [vmem:[#allocation0 + $0x57] ss:$-1 sm:$0xff] }
   0x7   :  { %80 = vst [vmem:[#allocation1 + $0x8] sm:$0xff] %v79_v14  ;;  %94 = vst [vmem:[#allocation1 + $0x10] sm:$0xff] %v93_v15  ;;  %v121_v20 = vrot.slane %v120_v18, 1  ;;  %v135_v21 = vrot.slane %v134_v19, 1  ;;  %v148_v22 = vld [vmem:[#allocation0 + $0x67] ss:$-1 sm:$0xff] }
   0x8   :  { %v162_v23 = vld [vmem:[#allocation0 + $0x77] ss:$-1 sm:$0xff]  ;;  %108 = vst [vmem:[#allocation1 + $0x18] sm:$0xff] %v107_v17  ;;  %v149_v24 = vrot.slane %v148_v22, 1 }
   0x9   :  { %v163_v25 = vrot.slane %v162_v23, 1  ;;  %v69_v26 = vld [vmem:[#allocation0 + $0xf] ss:$-1 sm:$0xff]  ;;  %v83_v27 = vld [vmem:[#allocation0 + $0x1f] ss:$-1 sm:$0xff]  ;;  %122 = vst [vmem:[#allocation1 + $0x20] sm:$0xff] %v121_v20 }
   0xa   :  { %v97_v28 = vld [vmem:[#allocation0 + $0x2f] ss:$-1 sm:$0xff]  ;;  %136 = vst [vmem:[#allocation1 + $0x28] sm:$0xff] %v135_v21  ;;  %v70_v29 = vrot.slane %v69_v26, 1  ;;  %v84_v30 = vrot.slane %v83_v27, 1  ;;  %150 = vst [vmem:[#allocation1 + $0x30] sm:$0xff] %v149_v24 }
   0xb   :  { %v98_v31 = vrot.slane %v97_v28, 1  ;;  %v111_v32 = vld [vmem:[#allocation0 + $0x3f] ss:$-1 sm:$0xff]  ;;  %164 = vst [vmem:[#allocation1 + $0x38] sm:$0xff] %v163_v25  ;;  %v125_v34 = vld [vmem:[#allocation0 + $0x4f] ss:$-1 sm:$0xff] }
   0xc   :  { %v112_v33 = vrot.slane %v111_v32, 1  ;;  %v139_v35 = vld [vmem:[#allocation0 + $0x5f] ss:$-1 sm:$0xff]  ;;  %74 = vst.msk [vmem:[#allocation1] sm:$0xff] %vm73_vm0, %v70_v29  ;;  %88 = vst.msk [vmem:[#allocation1 + $0x8] sm:$0xff] %vm73_vm0, %v84_v30  ;;  %v126_v36 = vrot.slane %v125_v34, 1 }
   0xd   :  { %102 = vst.msk [vmem:[#allocation1 + $0x10] sm:$0xff] %vm73_vm0, %v98_v31  ;;  %v140_v37 = vrot.slane %v139_v35, 1  ;;  %v153_v38 = vld [vmem:[#allocation0 + $0x6f] ss:$-1 sm:$0xff]  ;;  %v167_v39 = vld [vmem:[#allocation0 + $0x7f] ss:$-1 sm:$0xff] }
   0xe   :  { %116 = vst.msk [vmem:[#allocation1 + $0x18] sm:$0xff] %vm73_vm0, %v112_v33  ;;  %v154_v40 = vrot.slane %v153_v38, 1  ;;  %v168_v41 = vrot.slane %v167_v39, 1  ;;  %130 = vst.msk [vmem:[#allocation1 + $0x20] sm:$0xff] %vm73_vm0, %v126_v36 }
   0xf   :  { %144 = vst.msk [vmem:[#allocation1 + $0x28] sm:$0xff] %vm73_vm0, %v140_v37 }
  0x10   :  { %158 = vst.msk [vmem:[#allocation1 + $0x30] sm:$0xff] %vm73_vm0, %v154_v40  ;;  %172 = vst.msk [vmem:[#allocation1 + $0x38] sm:$0xff] %vm73_vm0, %v168_v41 }
  0x13   :  { %v214_v42 = vld [vmem:[#allocation1] sm:$0xff]  ;;  %v216_v43 = vld [vmem:[#allocation1 + $0x8] sm:$0xff] }
  0x14   :  { %v218_v44 = vld [vmem:[#allocation1 + $0x10] sm:$0xff]  ;;  %215 = vst [vmem:[%s330_s1] sm:$0xff] %v214_v42  ;;  %217 = vst [vmem:[%s330_s1 + $0x8] sm:$0xff] %v216_v43 }
  0x15   :  { %219 = vst [vmem:[%s330_s1 + $0x10] sm:$0xff] %v218_v44  ;;  %v220_v45 = vld [vmem:[#allocation1 + $0x18] sm:$0xff]  ;;  %v222_v46 = vld [vmem:[#allocation1 + $0x20] sm:$0xff] }
  0x16   :  { %221 = vst [vmem:[%s330_s1 + $0x18] sm:$0xff] %v220_v45  ;;  %v224_v47 = vld [vmem:[#allocation1 + $0x28] sm:$0xff]  ;;  %223 = vst [vmem:[%s330_s1 + $0x20] sm:$0xff] %v222_v46 }
  0x17   :  { %225 = vst [vmem:[%s330_s1 + $0x28] sm:$0xff] %v224_v47  ;;  %v226_v48 = vld [vmem:[#allocation1 + $0x30] sm:$0xff]  ;;  %v228_v49 = vld [vmem:[#allocation1 + $0x38] sm:$0xff] }
  0x18   :  { %227 = vst [vmem:[%s330_s1 + $0x30] sm:$0xff] %v226_v48  ;;  %229 = vst [vmem:[%s330_s1 + $0x38] sm:$0xff] %v228_v49 }

</bundles_post_ra>
